<compile_context>
chip_gen: v7x
topology: tpu7x:2x2x1
jax: 0.10.0
libtpu: 0.0.40
codegen_flags: <defaults>
</compile_context>

<pallas_src>
import jax
import jax.numpy as jnp
from jax.experimental import pallas as pl
from jax.experimental.pallas import tpu as pltpu

IN_FEATURES = 12
HIDDEN = 128
N_EMBD = 320
LN_EPS = 1e-5


def _round_up(n, m):
    return ((n + m - 1) // m) * m


def _cpte_kernel(x_ref, w1_ref, b1_ref, w2_ref, time_ref, w3_ref, b3_ref, o_ref):
    # Linear(12 -> 128); `x += position_embedding` is pre-folded into b1_eff.
    h = jnp.dot(x_ref[...], w1_ref[...], preferred_element_type=jnp.float32)
    h = h + b1_ref[...]                                                  # (TB, 128) f32

    # LayerNorm(128), eps=1e-5 — affine (gamma/beta) folded into w2_eff / b3_eff.
    # All f32 VPU/EUP work (v5e has no bf16 VPU/EUP).
    mean = jnp.mean(h, axis=-1, keepdims=True)
    cen = h - mean
    var = jnp.mean(cen * cen, axis=-1, keepdims=True)
    hn = cen * jax.lax.rsqrt(var + LN_EPS)

    # Linear(128 -> 320): bf16 MXU inputs, f32 accumulation.  b2 (+ LN-beta @ w2)
    # contribution is folded downstream into b3_eff.
    e = jnp.dot(hn.astype(w2_ref.dtype), w2_ref[...],
                preferred_element_type=jnp.float32)                      # (TB, 320)
    e = e + time_ref[...].astype(jnp.float32)                            # per-tile upcast

    # out_layer: Linear(320 -> 320), bf16 MXU inputs, f32 accumulate.
    out = jnp.dot(e.astype(w3_ref.dtype), w3_ref[...],
                  preferred_element_type=jnp.float32)                    # (TB, 320)
    out = out + b3_ref[...]

    o_ref[...] = out.astype(o_ref.dtype)


def prepare_params(p):
    """One-time (outside the hot path) weight prep / algebraic folds, all in f32:
         b1_eff = pos @ w1 + b1
         w2_eff = diag(ln_g) @ w2          (then cast bf16)
         b3_eff = (ln_b @ w2 + b2) @ w3 + b3
    """
    w1 = p["w1"].astype(jnp.float32)
    w2 = p["w2"].astype(jnp.float32)
    w3 = p["w3"].astype(jnp.float32)
    g = p["ln_g"].astype(jnp.float32)
    beta = p["ln_b"].astype(jnp.float32)

    b1_eff = (p["pos"].astype(jnp.float32) @ w1
              + p["b1"].astype(jnp.float32)).reshape(1, HIDDEN)
    w2_eff = g[:, None] * w2
    b2_eff = beta @ w2 + p["b2"].astype(jnp.float32)
    b3_eff = (b2_eff @ w3 + p["b3"].astype(jnp.float32)).reshape(1, N_EMBD)

    return {
        "w1": w1,                              # (12, 128) f32 (tiny)
        "b1_eff": b1_eff,                      # (1, 128)  f32
        "w2_eff": w2_eff.astype(jnp.bfloat16),  # (128, 320) bf16
        "w3": w3.astype(jnp.bfloat16),          # (320, 320) bf16
        "b3_eff": b3_eff,                      # (1, 320)  f32
    }


def color_palette_timestep_embedding(x, time, kparams, *, block_b=1024,
                                     out_dtype=jnp.bfloat16):
    """x: (B, ...) with prod(...) == 12; time: (B, 320), any float dtype
    (bf16 preferred — it is streamed as-is). Returns (B, 320) in `out_dtype`
    (set out_dtype=jnp.float32 if the consumer needs f32)."""
    B = x.shape[0]
    x2d = x.reshape(B, -1).astype(jnp.float32)
    assert x2d.shape[1] == IN_FEATURES
    # NOTE: no wrapper cast of `time` — it is DMA'd in its input dtype.

    # Adaptive batch tile: keeps padding minimal (avoids large jnp.pad copies)
    # and guarantees >= 2 grid blocks when B is large enough, so v7x's two
    # TensorCores both engage under dimension_semantics=("parallel",).
    nblk = pl.cdiv(B, block_b)
    if nblk < 2 and B > 16:
        nblk = 2
    tb = _round_up(pl.cdiv(B, nblk), 8)
    b_pad = _round_up(B, tb)
    if b_pad != B:
        x2d = jnp.pad(x2d, ((0, b_pad - B), (0, 0)))
        time = jnp.pad(time, ((0, b_pad - B), (0, 0)))
    grid = (b_pad // tb,)

    args = (x2d, kparams["w1"], kparams["b1_eff"], kparams["w2_eff"],
            time, kparams["w3"], kparams["b3_eff"])

    def _build(streamed_mode):
        def act_spec(feat):
            if streamed_mode is None:
                return pl.BlockSpec((tb, feat), lambda i: (i, 0))
            return pl.BlockSpec((tb, feat), lambda i: (i, 0),
                                pipeline_mode=streamed_mode)

        def const_spec(shape):
            # Constant block index -> weight DMA'd once, resident across the grid.
            return pl.BlockSpec(shape, lambda i: (0, 0))

        in_specs = [
            act_spec(IN_FEATURES),                                    # x tile
            const_spec((IN_FEATURES, HIDDEN)), const_spec((1, HIDDEN)),   # w1, b1_eff
            const_spec((HIDDEN, N_EMBD)),                             # w2_eff
            act_spec(N_EMBD),                                         # time tile
            const_spec((N_EMBD, N_EMBD)), const_spec((1, N_EMBD)),    # w3, b3_eff
        ]
        return pl.pallas_call(
            _cpte_kernel,
            out_shape=jax.ShapeDtypeStruct((b_pad, N_EMBD), out_dtype),
            grid=grid,
            in_specs=in_specs,
            out_specs=pl.BlockSpec((tb, N_EMBD), lambda i: (i, 0)),
            compiler_params=pltpu.CompilerParams(
                dimension_semantics=("parallel",)),   # 2x on v7x dual-TC
        )

    try:
        # 3-deep pipeline on the streamed operands (sweep 2 vs 3; VMEM is ample).
        out = _build(pl.Buffered(3))(*args)
    except Exception:
        # Fallback: default double-buffering (older JAX without pipeline_mode).
        out = _build(None)(*args)
    return out[:B]


def init_params(key):
    ks = jax.random.split(key, 6)
    scale = 0.02
    return {
        # position_embedding initialized to zeros in the PyTorch module
        "pos": jnp.zeros((IN_FEATURES,), jnp.float32),
        # Linear weights stored as (in, out) = torch_weight.T
        "w1": scale * jax.random.normal(ks[0], (IN_FEATURES, HIDDEN), jnp.float32),
        "b1": scale * jax.random.normal(ks[1], (HIDDEN,), jnp.float32),
        "ln_g": jnp.ones((HIDDEN,), jnp.float32),
        "ln_b": jnp.zeros((HIDDEN,), jnp.float32),
        "w2": scale * jax.random.normal(ks[2], (HIDDEN, N_EMBD), jnp.float32),
        "b2": scale * jax.random.normal(ks[3], (N_EMBD,), jnp.float32),
        "w3": scale * jax.random.normal(ks[4], (N_EMBD, N_EMBD), jnp.float32),
        "b3": scale * jax.random.normal(ks[5], (N_EMBD,), jnp.float32),
    }


def reference(x, time, p):
    """Pure-JAX f32 reference mirroring the PyTorch forward (f32 master weights)."""
    x = x.reshape(x.shape[0], -1) + p["pos"]
    h = x @ p["w1"] + p["b1"]
    mean = jnp.mean(h, axis=-1, keepdims=True)
    var = jnp.mean((h - mean) ** 2, axis=-1, keepdims=True)
    h = (h - mean) / jnp.sqrt(var + LN_EPS) * p["ln_g"] + p["ln_b"]
    e = h @ p["w2"] + p["b2"] + time
    return e @ p["w3"] + p["b3"]


if __name__ == "__main__":
    key = jax.random.PRNGKey(0)
    kp, kx, kt, kx2, kt2 = jax.random.split(key, 5)

    params = init_params(kp)
    kparams = prepare_params(params)   # one-time prep, outside the hot path

    # Case 1: tiny batch. A "color palette": 4 colors x 3 channels -> 12 features.
    B = 2
    x = jax.random.normal(kx, (B, 4, 3), jnp.float32)
    time_f32 = jax.random.normal(kt, (B, N_EMBD), jnp.float32)
    time_bf16 = time_f32.astype(jnp.bfloat16)   # streamed in bf16 (halves HBM bytes)

    out = color_palette_timestep_embedding(x, time_bf16, kparams)
    out = jax.block_until_ready(out)
    ref = reference(x, time_f32, params)
    assert out.shape == (B, N_EMBD)
    # Tolerance loosened vs the f32 reference: bf16 w2/w3, bf16 MXU inputs,
    # bf16 time stream and bf16 output (f32 accumulation throughout).
    assert jnp.allclose(out.astype(jnp.float32), ref, atol=3e-2, rtol=3e-2), \
        "mismatch vs reference (B=2)"

    # Case 2: ragged batch — exercises adaptive tiling and the >=2-block
    # (dual-TensorCore) path, still at a small shape.
    B2 = 100
    x2 = jax.random.normal(kx2, (B2, IN_FEATURES), jnp.float32)
    t2_f32 = jax.random.normal(kt2, (B2, N_EMBD), jnp.float32)
    out2 = jax.block_until_ready(
        color_palette_timestep_embedding(x2, t2_f32.astype(jnp.bfloat16), kparams))
    ref2 = reference(x2, t2_f32, params)
    assert out2.shape == (B2, N_EMBD)
    assert jnp.allclose(out2.astype(jnp.float32), ref2, atol=3e-2, rtol=3e-2), \
        "mismatch vs reference (B=100)"

    print("KERNEL_OK")
</pallas_src>

<mosaic_0001>
module attributes {stable_mosaic.version = 11 : i64} {
  func.func @_cpte_kernel(%arg0: i32, %arg1: memref<8x12xf32, #tpu.memory_space<vmem>>, %arg2: memref<12x128xf32, #tpu.memory_space<vmem>>, %arg3: memref<1x128xf32, #tpu.memory_space<vmem>>, %arg4: memref<128x320xbf16, #tpu.memory_space<vmem>>, %arg5: memref<8x320xbf16, #tpu.memory_space<vmem>>, %arg6: memref<320x320xbf16, #tpu.memory_space<vmem>>, %arg7: memref<1x320xf32, #tpu.memory_space<vmem>>, %arg8: memref<8x320xbf16, #tpu.memory_space<vmem>>) attributes {dimension_semantics = [#tpu.dimension_semantics<parallel>], iteration_bounds = array<i64: 1>, scalar_prefetch = 0 : i64, scratch_operands = 0 : i64, tpu.core_type = #tpu.core_type<tc>, window_params = [{transform_indices = @transform_0, window_bounds = array<i64: 8, 12>}, {pipeline_mode = #tpu.pipeline_mode<synchronous>, transform_indices = @transform_1, window_bounds = array<i64: 12, 128>}, {pipeline_mode = #tpu.pipeline_mode<synchronous>, transform_indices = @transform_2, window_bounds = array<i64: 1, 128>}, {pipeline_mode = #tpu.pipeline_mode<synchronous>, transform_indices = @transform_3, window_bounds = array<i64: 128, 320>}, {transform_indices = @transform_4, window_bounds = array<i64: 8, 320>}, {pipeline_mode = #tpu.pipeline_mode<synchronous>, transform_indices = @transform_5, window_bounds = array<i64: 320, 320>}, {pipeline_mode = #tpu.pipeline_mode<synchronous>, transform_indices = @transform_6, window_bounds = array<i64: 1, 320>}, {transform_indices = @transform_7, window_bounds = array<i64: 8, 320>}]} {
    %c0 = arith.constant 0 : index
    %c0_0 = arith.constant 0 : index
    %0 = vector.load %arg1[%c0, %c0_0] : memref<8x12xf32, #tpu.memory_space<vmem>>, vector<8x12xf32>
    %c0_1 = arith.constant 0 : index
    %c0_2 = arith.constant 0 : index
    %1 = vector.load %arg2[%c0_1, %c0_2] : memref<12x128xf32, #tpu.memory_space<vmem>>, vector<12x128xf32>
    %cst = arith.constant dense<0.000000e+00> : vector<8x128xf32>
    %2 = tpu.matmul %0, %1, %cst {dimension_numbers = #tpu.dot_dimension_numbers<[1], [0], [0], [1], [0, 0, 1, 1], [], []>} : vector<8x12xf32>, vector<12x128xf32>, vector<8x128xf32> -> vector<8x128xf32>
    %c0_3 = arith.constant 0 : index
    %c0_4 = arith.constant 0 : index
    %3 = vector.load %arg3[%c0_3, %c0_4] : memref<1x128xf32, #tpu.memory_space<vmem>>, vector<1x128xf32>
    %4 = vector.broadcast %3 : vector<1x128xf32> to vector<8x128xf32>
    %5 = arith.addf %2, %4 : vector<8x128xf32>
    %cst_5 = arith.constant dense<0.000000e+00> : vector<8xf32>
    %6 = vector.multi_reduction <add>, %5, %cst_5 [1] : vector<8x128xf32> to vector<8xf32>
    %7 = vector.shape_cast %6 : vector<8xf32> to vector<8x1xf32>
    %cst_6 = arith.constant 1.280000e+02 : f32
    %8 = vector.broadcast %cst_6 : f32 to vector<8x1xf32>
    %9 = arith.divf %7, %8 : vector<8x1xf32>
    %10 = vector.broadcast %9 : vector<8x1xf32> to vector<8x128xf32>
    %11 = arith.subf %5, %10 : vector<8x128xf32>
    %12 = arith.mulf %11, %11 : vector<8x128xf32>
    %cst_7 = arith.constant dense<0.000000e+00> : vector<8xf32>
    %13 = vector.multi_reduction <add>, %12, %cst_7 [1] : vector<8x128xf32> to vector<8xf32>
    %14 = vector.shape_cast %13 : vector<8xf32> to vector<8x1xf32>
    %cst_8 = arith.constant 1.280000e+02 : f32
    %15 = vector.broadcast %cst_8 : f32 to vector<8x1xf32>
    %16 = arith.divf %14, %15 : vector<8x1xf32>
    %cst_9 = arith.constant 9.99999974E-6 : f32
    %17 = vector.broadcast %cst_9 : f32 to vector<8x1xf32>
    %18 = arith.addf %16, %17 : vector<8x1xf32>
    %19 = math.rsqrt %18 : vector<8x1xf32>
    %20 = vector.broadcast %19 : vector<8x1xf32> to vector<8x128xf32>
    %21 = arith.mulf %11, %20 : vector<8x128xf32>
    %22 = arith.truncf %21 : vector<8x128xf32> to vector<8x128xbf16>
    %c0_10 = arith.constant 0 : index
    %c0_11 = arith.constant 0 : index
    %23 = vector.load %arg4[%c0_10, %c0_11] : memref<128x320xbf16, #tpu.memory_space<vmem>>, vector<128x320xbf16>
    %cst_12 = arith.constant dense<0.000000e+00> : vector<8x320xf32>
    %24 = tpu.matmul %22, %23, %cst_12 {dimension_numbers = #tpu.dot_dimension_numbers<[1], [0], [0], [1], [0, 0, 1, 1], [], []>} : vector<8x128xbf16>, vector<128x320xbf16>, vector<8x320xf32> -> vector<8x320xf32>
    %c0_13 = arith.constant 0 : index
    %c0_14 = arith.constant 0 : index
    %25 = vector.load %arg5[%c0_13, %c0_14] : memref<8x320xbf16, #tpu.memory_space<vmem>>, vector<8x320xbf16>
    %26 = arith.extf %25 : vector<8x320xbf16> to vector<8x320xf32>
    %27 = arith.addf %24, %26 : vector<8x320xf32>
    %28 = arith.truncf %27 : vector<8x320xf32> to vector<8x320xbf16>
    %c0_15 = arith.constant 0 : index
    %c0_16 = arith.constant 0 : index
    %29 = vector.load %arg6[%c0_15, %c0_16] : memref<320x320xbf16, #tpu.memory_space<vmem>>, vector<320x320xbf16>
    %cst_17 = arith.constant dense<0.000000e+00> : vector<8x320xf32>
    %30 = tpu.matmul %28, %29, %cst_17 {dimension_numbers = #tpu.dot_dimension_numbers<[1], [0], [0], [1], [0, 0, 1, 1], [], []>} : vector<8x320xbf16>, vector<320x320xbf16>, vector<8x320xf32> -> vector<8x320xf32>
    %c0_18 = arith.constant 0 : index
    %c0_19 = arith.constant 0 : index
    %31 = vector.load %arg7[%c0_18, %c0_19] : memref<1x320xf32, #tpu.memory_space<vmem>>, vector<1x320xf32>
    %32 = vector.broadcast %31 : vector<1x320xf32> to vector<8x320xf32>
    %33 = arith.addf %30, %32 : vector<8x320xf32>
    %34 = arith.truncf %33 : vector<8x320xf32> to vector<8x320xbf16>
    %c0_20 = arith.constant 0 : index
    %c0_21 = arith.constant 0 : index
    %35 = vector.load %arg8[%c0_20, %c0_21] : memref<8x320xbf16, #tpu.memory_space<vmem>>, vector<8x320xbf16>
    tpu.vector_store %arg8[%c0_20, %c0_21], %34 {strides = array<i32>} : memref<8x320xbf16, #tpu.memory_space<vmem>>, vector<8x320xbf16>,
    return
  }
  func.func @transform_0(%arg0: i32) -> (i32, i32) {
    %c0_i32 = arith.constant 0 : i32
    %c0_i32_0 = arith.constant 0 : i32
    return %arg0, %c0_i32 : i32, i32
  }
  func.func @transform_1(%arg0: i32) -> (i32, i32) {
    %c0_i32 = arith.constant 0 : i32
    %c0_i32_0 = arith.constant 0 : i32
    %c0_i32_1 = arith.constant 0 : i32
    return %c0_i32, %c0_i32_0 : i32, i32
  }
  func.func @transform_2(%arg0: i32) -> (i32, i32) {
    %c0_i32 = arith.constant 0 : i32
    %c0_i32_0 = arith.constant 0 : i32
    %c0_i32_1 = arith.constant 0 : i32
    return %c0_i32, %c0_i32_0 : i32, i32
  }
  func.func @transform_3(%arg0: i32) -> (i32, i32) {
    %c0_i32 = arith.constant 0 : i32
    %c0_i32_0 = arith.constant 0 : i32
    %c0_i32_1 = arith.constant 0 : i32
    return %c0_i32, %c0_i32_0 : i32, i32
  }
  func.func @transform_4(%arg0: i32) -> (i32, i32) {
    %c0_i32 = arith.constant 0 : i32
    %c0_i32_0 = arith.constant 0 : i32
    return %arg0, %c0_i32 : i32, i32
  }
  func.func @transform_5(%arg0: i32) -> (i32, i32) {
    %c0_i32 = arith.constant 0 : i32
    %c0_i32_0 = arith.constant 0 : i32
    %c0_i32_1 = arith.constant 0 : i32
    return %c0_i32, %c0_i32_0 : i32, i32
  }
  func.func @transform_6(%arg0: i32) -> (i32, i32) {
    %c0_i32 = arith.constant 0 : i32
    %c0_i32_0 = arith.constant 0 : i32
    %c0_i32_1 = arith.constant 0 : i32
    return %c0_i32, %c0_i32_0 : i32, i32
  }
  func.func @transform_7(%arg0: i32) -> (i32, i32) {
    %c0_i32 = arith.constant 0 : i32
    %c0_i32_0 = arith.constant 0 : i32
    return %arg0, %c0_i32 : i32, i32
  }
}

</mosaic_0001>

<bundles_post_ra>
// kernel: tpu_custom_call.1
= control target key start
LH: loop header
LB: loop body
LE: loop exit
PB: predicated region body
PF: predicated region fallthrough
CT: control target
= control target key end

     0   :  { %12 = vsyncpa [#allocation3], 0  ;;  %s1542_s0 = inlined_call_operand.vmem [shape: f32[8,12], index: 0, kind: input, shape index: {}]   ;;  %s1543_s1 = inlined_call_operand.vmem [shape: f32[12,128], index: 1, kind: input, shape index: {}]   ;;  %s1544_s2 = inlined_call_operand.vmem [shape: f32[1,128], index: 2, kind: input, shape index: {}]   ;;  %s1545_s3 = inlined_call_operand.vmem [shape: bf16[128,320], index: 3, kind: input, shape index: {}]   ;;  %s1546_s4 = inlined_call_operand.vmem [shape: bf16[8,320], index: 4, kind: input, shape index: {}]   ;;  %s1547_s5 = inlined_call_operand.hbm [shape: bf16[320,320], index: 5, kind: input, shape index: {}]   ;;  %s1548_s6 = inlined_call_operand.vmem [shape: f32[1,320], index: 6, kind: input, shape index: {}]   ;;  %s1549_s7 = inlined_call_operand.hbm [shape: bf16[8,320], index: 7, kind: output, shape index: {}]  }
   0x1   :  { %13 = vsyncpa [#allocation4], 0  ;;  %s1356_s24 = smov [#allocation2]   ;;  %s1308_s28 = scalar_lea.hbm %s1547_s5, 7680 }
   0x2   :  { %s29_s25 = sshll.u32 %s1356_s24, 4  ;;  %p1309_p0 = scmp.ne.s32.totalorder %s1547_s5, %s1308_s28  ;;  %s30_s25 = int_to_ptr.vmem [resolvable:$true] %s29_s25 }
   0x3   :  { %p1312_p1 = scmp.lt.u32.totalorder %s1308_s28, %s1547_s5 }
   0x5   :  { %p1314_p2 = pnand %p1312_p1, %p1309_p0 }
   0x7   :  { %1317 = shalt.err (!%p1314_p2)
}
   0x8   :  { %s1318_s10 = scalar_lea.vmem %s30_s25, 7680  ;;  %p1323_p4 = scmp.lt.s32.totalorder %s30_s25, %s30_s25 }
   0x9   :  { %p1319_p3 = scmp.ne.s32.totalorder %s30_s25, %s1318_s10  ;;  %p1324_p5 = scmp.lt.s32.totalorder %s1318_s10, %s1318_s10 }
   0xb   :  { %p1325_p6 = por %p1324_p5, %p1323_p4 }
   0xd   :  { %p1326_p7 = pnand %p1325_p6, %p1319_p3 }
   0xf   :  { %1329 = shalt.err (!%p1326_p7)
}
  0x10   :  { %s1357_s11 = smov 192   ;;  %s1358_s12 = smov 12  }
  0x11   :  { %35 = dma.hbm_to_vmem [thread:$0]  %s1547_s5, 7680, %s30_s25, [#allocation3], %s1357_s11, %s1357_s11, %s1358_s12  }
  0x12   :  { %1352 = dma.done.wait [#allocation3], 7680  }
  0x13   :  { %1353 = vsyncadd [#allocation3], 4294959616  ;;  %v1359_v0 = vmov 0.0|0.0   ;;  %vm1360_vm0 = vmmov 0   ;;  %v1361_v1 = vmov 0.0   ;;  %vm56_vm1 = vcmask 1043456  }
  0x14   :  { %1177 = vmatprep.subr.bf16.mxu0 %v1359_v0  ;;  %1142 = vmatprep.mubr.msk.f32.mxu0 %vm1360_vm0, %v1361_v1  ;;  %v43_v2 = vld [vmem:[%s1543_s1] sm:$0xff]  ;;  %v44_v3 = vld [vmem:[%s1543_s1 + $0x8] sm:$0xf]  ;;  %vm1362_vm2 = vmmov 1   ;;  %vm52_vm4 = vcmask 97280   ;;  %v1363_v36 = vmov 0  }
  0x15   :  { %vm1179_vm3 = vmpackc.low %vm56_vm1, %vm1362_vm2  ;;  %v1178_v4 = vpack.c.bf16 %v44_v3, %v43_v2  ;;  %v42_v5 = vld [vmem:[%s1542_s0] sm:$0xff]  ;;  %v1197_v12 = vld [vmem:[%s1545_s3 + $0x8] ss:$12 sps:$4 sm:$0xff]   ;;  %340 = vmatprep.mubr.bf16.mxu1 %v1363_v36  ;;  %vm809_vm5 = vcmask 523264   ;;  %vm989_vm6 = vcmask 519168  }
  0x16   :  { %v1006_v6 = vld [vmem:[%s1544_s2] ss:$0 sm:$0xff]  ;;  %v1194_v10 = vld [vmem:[%s1545_s3 + $0x4] ss:$12 sps:$4 sm:$0xff]   ;;  %v1198_v13 = vld [vmem:[%s1545_s3 + $0x1c] ss:$12 sps:$4 sm:$0xff]  }
  0x17   :  { %1180 = vmatpush3.bf16.msk.msra.mxu0 %vm1179_vm3, %v1178_v4  ;;  %v1196_v11 = vld [vmem:[%s1545_s3] ss:$12 sps:$4 sm:$0xff]   ;;  %308 = vmatprep.subr.bf16.mxu1 %v1194_v10  ;;  %v1200_v15 = vld [vmem:[%s1545_s3 + $0x18] ss:$12 sps:$4 sm:$0xff]   ;;  %v1204_v18 = vld [vmem:[%s1545_s3 + $0x30] ss:$12 sps:$4 sm:$0xff]  }
  0x18   :  { %1145 = vmatprep.subr.bf16.mxu0 %v1361_v1  ;;  %v1201_v14 = vld [vmem:[%s1545_s3 + $0x20] ss:$12 sps:$4 sm:$0xff]   ;;  %309 = vmatpush1.bf16.msra.mxu1 %v1196_v11  ;;  %v1205_v17 = vld [vmem:[%s1545_s3 + $0x38] ss:$12 sps:$4 sm:$0xff]   ;;  %v1208_v24 = vld [vmem:[%s1545_s3 + $0x48] ss:$12 sps:$4 sm:$0xff]  }
  0x19   :  { %310 = vmatprep.subr.bf16.mxu1 %v1198_v13  ;;  %v1202_v16 = vld [vmem:[%s1545_s3 + $0x34] ss:$12 sps:$4 sm:$0xff]   ;;  %v1206_v19 = vld [vmem:[%s1545_s3 + $0x4c] ss:$12 sps:$4 sm:$0xff]   ;;  %v1209_v25 = vld [vmem:[%s1545_s3 + $0x50] ss:$12 sps:$4 sm:$0xff]  }
  0x1a   :  { %1143 = vmatmul.mubr.msk.f32.vlgmr.msra.gmra.mrb[0].mxu0 %vm52_vm4, %v42_v5  ;;  %v1210_v26 = vld [vmem:[%s1545_s3 + $0x64] ss:$12 sps:$4 sm:$0xff]   ;;  %v1212_v27 = vld [vmem:[%s1545_s3 + $0x60] ss:$12 sps:$4 sm:$0xff]   ;;  %v1213_v28 = vld [vmem:[%s1545_s3 + $0x68] ss:$12 sps:$4 sm:$0xff]  }
  0x1b   :  { %1161 = vmatprep.mubr.msk.bf16.mxu0 %vm1360_vm0, %v1361_v1  ;;  %1146 = vmatpush3.bf16.msra.mxu0 %v1197_v12  ;;  %v1214_v29 = vld [vmem:[%s1545_s3 + $0x7c] ss:$12 sps:$4 sm:$0xff]   ;;  %v1216_v30 = vld [vmem:[%s1545_s3 + $0x78] ss:$12 sps:$4 sm:$0xff]   ;;  %v1217_v31 = vld [vmem:[%s1545_s3 + $0x80] ss:$12 sps:$4 sm:$0xff]  }
  0x1c   :  { %1147 = vmatprep.subr.bf16.mxu0 %v1361_v1  ;;  %311 = vmatpush1.bf16.msra.mxu1 %v1200_v15  ;;  %v1218_v32 = vld [vmem:[%s1545_s3 + $0x94] ss:$12 sps:$4 sm:$0xff]   ;;  %v1220_v33 = vld [vmem:[%s1545_s3 + $0x90] ss:$12 sps:$4 sm:$0xff]   ;;  %v1221_v34 = vld [vmem:[%s1545_s3 + $0x98] ss:$12 sps:$4 sm:$0xff]  }
  0x1d   :  { %312 = vmatprep.subr.bf16.mxu1 %v1202_v16  ;;  %v1222_v35 = vld [vmem:[%s1545_s3 + $0xac] ss:$12 sps:$4 sm:$0xff]   ;;  %v1224_v37 = vld [vmem:[%s1545_s3 + $0xa8] ss:$12 sps:$4 sm:$0xff]   ;;  %v1225_v38 = vld [vmem:[%s1545_s3 + $0xb0] ss:$12 sps:$4 sm:$0xff]  }
  0x1e   :  { %v1228_v39 = vld [vmem:[#allocation2 + $0x4] ss:$12 sps:$4 sm:$0xff]   ;;  %v1226_v46 = vld [vmem:[#allocation2] ss:$12 sps:$4 sm:$0xff]   ;;  %v1231_v49 = vld [vmem:[#allocation2 + $0x1c] ss:$12 sps:$4 sm:$0xff]  }
  0x1f   :  { %1148 = vmatpush3.bf16.msra.mxu0 %v1201_v14  ;;  %v1264_v40 = vld [vmem:[#allocation2 + $0x184] ss:$12 sps:$4 sm:$0xff]   ;;  %v1262_v47 = vld [vmem:[#allocation2 + $0x180] ss:$12 sps:$4 sm:$0xff]   ;;  %v1270_v50 = vld [vmem:[#allocation2 + $0x19c] ss:$12 sps:$4 sm:$0xff]  }
  0x20   :  { %1149 = vmatprep.subr.bf16.mxu0 %v1361_v1  ;;  %313 = vmatpush1.bf16.msra.mxu1 %v1204_v18  ;;  %v1229_v51 = vld [vmem:[#allocation2 + $0x18] ss:$12 sps:$4 sm:$0xff]   ;;  %v1234_v53 = vld [vmem:[#allocation2 + $0x34] ss:$12 sps:$4 sm:$0xff]   ;;  %v1232_v55 = vld [vmem:[#allocation2 + $0x30] ss:$12 sps:$4 sm:$0xff]  }
  0x21   :  { %314 = vmatprep.subr.bf16.mxu1 %v1206_v19  ;;  %v1268_v52 = vld [vmem:[#allocation2 + $0x198] ss:$12 sps:$4 sm:$0xff]   ;;  %v1276_v54 = vld [vmem:[#allocation2 + $0x1b4] ss:$12 sps:$4 sm:$0xff]   ;;  %v1274_v56 = vld [vmem:[#allocation2 + $0x1b0] ss:$12 sps:$4 sm:$0xff]  }
  0x22   :  { %v1237_v57 = vld [vmem:[#allocation2 + $0x4c] ss:$12 sps:$4 sm:$0xff]   ;;  %v1235_v58 = vld [vmem:[#allocation2 + $0x48] ss:$12 sps:$4 sm:$0xff]   ;;  %v1240_v59 = vld [vmem:[#allocation2 + $0x64] ss:$12 sps:$4 sm:$0xff]  }
  0x23   :  { %1150 = vmatpush3.bf16.msra.mxu0 %v1205_v17  ;;  %v1238_v60 = vld [vmem:[#allocation2 + $0x60] ss:$12 sps:$4 sm:$0xff]   ;;  %v1243_v61 = vld [vmem:[#allocation2 + $0x7c] ss:$12 sps:$4 sm:$0xff]   ;;  %v1241_v62 = vld [vmem:[#allocation2 + $0x78] ss:$12 sps:$4 sm:$0xff]  }
  0x24   :  { %1151 = vmatprep.subr.bf16.mxu0 %v1361_v1  ;;  %315 = vmatpush1.bf16.msra.mxu1 %v1208_v24  ;;  %v1246_v63 = vld [vmem:[#allocation2 + $0x94] ss:$12 sps:$4 sm:$0xff]   ;;  %v1244_v0 = vld [vmem:[#allocation2 + $0x90] ss:$12 sps:$4 sm:$0xff]   ;;  %v1249_v2 = vld [vmem:[#allocation2 + $0xac] ss:$12 sps:$4 sm:$0xff]  }
  0x25   :  { %316 = vmatprep.subr.bf16.mxu1 %v1210_v26  ;;  %v1247_v3 = vld [vmem:[#allocation2 + $0xa8] ss:$12 sps:$4 sm:$0xff]   ;;  %v1252_v4 = vld [vmem:[#allocation2 + $0xc4] ss:$12 sps:$4 sm:$0xff]   ;;  %v1250_v5 = vld [vmem:[#allocation2 + $0xc0] ss:$12 sps:$4 sm:$0xff]  }
  0x26   :  { %v1261_v10 = vld [vmem:[#allocation2 + $0x10c] ss:$12 sps:$4 sm:$0xff]   ;;  %v1259_v11 = vld [vmem:[#allocation2 + $0x108] ss:$12 sps:$4 sm:$0xff]   ;;  %v1267_v12 = vld [vmem:[#allocation2 + $0x124] ss:$12 sps:$4 sm:$0xff]  }
  0x27   :  { %1152 = vmatpush3.bf16.msra.mxu0 %v1209_v25  ;;  %v1265_v13 = vld [vmem:[#allocation2 + $0x120] ss:$12 sps:$4 sm:$0xff]   ;;  %v1273_v14 = vld [vmem:[#allocation2 + $0x13c] ss:$12 sps:$4 sm:$0xff]   ;;  %v1271_v15 = vld [vmem:[#allocation2 + $0x138] ss:$12 sps:$4 sm:$0xff]  }
  0x28   :  { %1153 = vmatprep.subr.bf16.mxu0 %v1361_v1  ;;  %317 = vmatpush1.bf16.msra.mxu1 %v1212_v27  ;;  %v1279_v16 = vld [vmem:[#allocation2 + $0x154] ss:$12 sps:$4 sm:$0xff]   ;;  %v1277_v17 = vld [vmem:[#allocation2 + $0x150] ss:$12 sps:$4 sm:$0xff]   ;;  %v1282_v18 = vld [vmem:[#allocation2 + $0x1cc] ss:$12 sps:$4 sm:$0xff]  }
  0x29   :  { %318 = vmatprep.subr.bf16.mxu1 %v1214_v29  ;;  %v1280_v19 = vld [vmem:[#allocation2 + $0x1c8] ss:$12 sps:$4 sm:$0xff]  }
  0x2a   :  { %v176_v24 = vld [vmem:[%s1546_s4 + $0x8] sm:$0xf] }
  0x2b   :  { %1154 = vmatpush3.bf16.msra.mxu0 %v1213_v28  ;;  %v179_v26 = vunpack.c.l.bf16 %v176_v24 }
  0x2c   :  { %1155 = vmatprep.subr.bf16.mxu0 %v1361_v1  ;;  %319 = vmatpush1.bf16.msra.mxu1 %v1216_v30 }
  0x2d   :  { %320 = vmatprep.subr.bf16.mxu1 %v1218_v32 }
  0x2f   :  { %1156 = vmatpush3.bf16.msra.mxu0 %v1217_v31 }
  0x30   :  { %1157 = vmatprep.subr.bf16.mxu0 %v1361_v1  ;;  %321 = vmatpush1.bf16.msra.mxu1 %v1220_v33 }
  0x31   :  { %322 = vmatprep.subr.bf16.mxu1 %v1222_v35 }
  0x33   :  { %1158 = vmatpush3.bf16.msra.mxu0 %v1221_v34 }
  0x34   :  { %1159 = vmatprep.subr.bf16.mxu0 %v1361_v1  ;;  %323 = vmatpush1.bf16.msra.mxu1 %v1224_v37  ;;  %v1287_v37 = vld [vmem:[#allocation2 + $0x8] ss:$12 sps:$4 sm:$0xff]  }
  0x35   :  { %813 = vmatprep.subr.bf16.mxu1 %v1228_v39 }
  0x37   :  { %1160 = vmatpush3.bf16.msra.mxu0 %v1225_v38 }
  0x38   :  { %854 = vmatprep.subr.bf16.mxu0 %v1264_v40 }
  0xed   :  { %v126_v7 = vpop.f32.mrb[0].mxu0 }
  0xee   :  { %v127_v8 = vadd.f32 %v1006_v6, %v126_v7  ;;  %v1144_v9 = vpop.f32.mrb[1].mxu0  ;;  %v1255_v6 = vld [vmem:[#allocation2 + $0xdc] ss:$12 sps:$4 sm:$0xff]   ;;  %v1253_v7 = vld [vmem:[#allocation2 + $0xd8] ss:$12 sps:$4 sm:$0xff]  }
  0xef   :  { %v1256_v9 = vld [vmem:[#allocation2 + $0xf0] ss:$12 sps:$4 sm:$0xff]  }
  0xf0   :  { %130 = vadd.xlane.f32.xlu0 %v127_v8 }
 0x17d   :  { %v131_v20 = vpop.xlane.xlu0 %130 }
 0x17e   :  { %v133_v21 = vmul.f32 0.0078125, %v131_v20  ;;  %v1285_v20 = vld [vmem:[#allocation2 + $0x16c] ss:$12 sps:$4 sm:$0xff]  }
 0x180   :  { %v134_v22 = vsub.f32 %v127_v8, %v133_v21  ;;  %v1258_v8 = vld [vmem:[#allocation2 + $0xf4] ss:$12 sps:$4 sm:$0xff]  }
 0x181   :  { %v1283_v21 = vld [vmem:[#allocation2 + $0x168] ss:$12 sps:$4 sm:$0xff]  }
 0x182   :  { %v135_v23 = vmul.f32 %v134_v22, %v134_v22 }
 0x184   :  { %136 = vadd.xlane.f32.xlu0 %v135_v23  ;;  %v175_v23 = vld [vmem:[%s1546_s4] sm:$0xff] }
 0x185   :  { %v177_v25 = vunpack.c.l.bf16 %v175_v23  ;;  %v178_v27 = vunpack.c.h.bf16 %v175_v23 }
 0x211   :  { %v137_v41 = vpop.xlane.xlu0 %136 }
 0x212   :  { %v138_v42 = vmul.f32 0.0078125, %v137_v41 }
 0x214   :  { %v139_v43 = vadd.f32 1e-05, %v138_v42  ;;  %v1288_v42 = vld [vmem:[#allocation2 + $0xe0] ss:$12 sps:$4 sm:$0xff]  }
 0x216   :  { %1306 = vrsqrt.f32 %v139_v43 }
 0x220   :  { %v1307_v44 = vpop.eup %1306 }
 0x221   :  { %v141_v45 = vmul.f32 %v1307_v44, %v134_v22  ;;  %v1286_v22 = vld [vmem:[#allocation2 + $0xc8] ss:$12 sps:$4 sm:$0xff]   ;;  %v1289_v44 = vld [vmem:[#allocation2 + $0x20] ss:$12 sps:$4 sm:$0xff]  }
 0x223   :  { %v142_v48 = vpack.c.bf16 %v141_v45, %v141_v45  ;;  %v1290_v45 = vld [vmem:[#allocation2 + $0xf8] ss:$12 sps:$4 sm:$0xff]  }
 0x225   :  { %341 = vmatmul.mubr.bf16.vlgmr.msra.gmra.mrb[0].mxu1 %v142_v48  ;;  %1162 = vmatmul.mubr.bf16.vlgmr.msra.gmra.mrb[4].mxu0 %v142_v48  ;;  %v1293_v48 = vld [vmem:[#allocation2 + $0x50] ss:$12 sps:$4 sm:$0xff]  }
 0x226   :  { %814 = vmatpush1.bf16.msra.mxu1 %v1226_v46  ;;  %855 = vmatpush1.bf16.msra.mxu0 %v1262_v47  ;;  %v1291_v46 = vld [vmem:[#allocation2 + $0x38] ss:$12 sps:$4 sm:$0xff]   ;;  %v1292_v47 = vld [vmem:[#allocation2 + $0x110] ss:$12 sps:$4 sm:$0xff]  }
 0x227   :  { %815 = vmatprep.subr.bf16.mxu1 %v1231_v49  ;;  %856 = vmatprep.subr.bf16.mxu0 %v1270_v50  ;;  %v1294_v49 = vld [vmem:[#allocation2 + $0x128] ss:$12 sps:$4 sm:$0xff]  }
 0x228   :  { %886 = vmatprep.mubr.bf16.mxu0 %v1363_v36  ;;  %v1295_v50 = vld [vmem:[#allocation2 + $0x68] ss:$12 sps:$4 sm:$0xff]  }
 0x22a   :  { %816 = vmatpush1.bf16.msra.mxu1 %v1229_v51  ;;  %857 = vmatpush1.bf16.msra.mxu0 %v1268_v52  ;;  %v1296_v51 = vld [vmem:[#allocation2 + $0x140] ss:$12 sps:$4 sm:$0xff]  }
 0x22b   :  { %817 = vmatprep.subr.bf16.mxu1 %v1234_v53  ;;  %858 = vmatprep.subr.bf16.mxu0 %v1276_v54  ;;  %v1297_v52 = vld [vmem:[#allocation2 + $0x80] ss:$12 sps:$4 sm:$0xff]   ;;  %v1298_v53 = vld [vmem:[#allocation2 + $0x158] ss:$12 sps:$4 sm:$0xff]  }
 0x22c   :  { %v1299_v54 = vld [vmem:[#allocation2 + $0x98] ss:$12 sps:$4 sm:$0xff]  }
 0x22e   :  { %818 = vmatpush1.bf16.msra.mxu1 %v1232_v55  ;;  %859 = vmatpush1.bf16.msra.mxu0 %v1274_v56  ;;  %v1300_v55 = vld [vmem:[#allocation2 + $0x170] ss:$12 sps:$4 sm:$0xff]  }
 0x22f   :  { %819 = vmatprep.subr.bf16.mxu1 %v1237_v57  ;;  %860 = vmatprep.subr.bf16.mxu0 %v1282_v18  ;;  %v1301_v56 = vld [vmem:[#allocation2 + $0xb0] ss:$12 sps:$4 sm:$0xff]   ;;  %v1302_v57 = vld [vmem:[#allocation2 + $0x188] ss:$12 sps:$4 sm:$0xff]  }
 0x232   :  { %820 = vmatpush1.bf16.msra.mxu1 %v1235_v58  ;;  %861 = vmatpush1.bf16.msra.mxu0 %v1280_v19  ;;  %v1303_v58 = vld [vmem:[#allocation2 + $0x1a0] ss:$12 sps:$4 sm:$0xff]  }
 0x233   :  { %821 = vmatprep.subr.bf16.mxu1 %v1240_v59  ;;  %1111 = vmatprep.subr.bf16.mxu0 %v1286_v22  ;;  %v1304_v59 = vld [vmem:[#allocation2 + $0x1b8] ss:$12 sps:$4 sm:$0xff]  }
 0x236   :  { %822 = vmatpush1.bf16.msra.mxu1 %v1238_v60  ;;  %v1305_v60 = vld [vmem:[#allocation2 + $0x1d0] ss:$12 sps:$4 sm:$0xff]  }
 0x237   :  { %823 = vmatprep.subr.bf16.mxu1 %v1243_v61  ;;  %v474_v61 = vlaneseq }
 0x23a   :  { %824 = vmatpush1.bf16.msra.mxu1 %v1241_v62  ;;  %v475_v62 = vshrl.u32 %v474_v61, 7 }
 0x23b   :  { %825 = vmatprep.subr.bf16.mxu1 %v1246_v63 }
 0x23c   :  { %v476_v63 = vsub.s32 0, %v475_v62  ;;  %v484_v22 = vsub.s32 2, %v475_v62 }
 0x23e   :  { %826 = vmatpush1.bf16.msra.mxu1 %v1244_v0  ;;  %v472_v0 = vld [vmem:[%s1548_s6] sm:$0x7]  ;;  %s1364_s6 = smov [#allocation5]  }
 0x23f   :  { %827 = vmatprep.subr.bf16.mxu1 %v1249_v2  ;;  %v480_v2 = vsub.s32 1, %v475_v62  ;;  %v485_v23 = vrot.slane %v472_v0, %v484_v22  ;;  %s997_s20 = sshll.u32 %s1364_s6, 4  ;;  %s998_s20 = int_to_ptr.vmem [resolvable:$true] %s997_s20 }
 0x240   :  { %s1330_s21 = scalar_lea.vmem %s998_s20, 192  ;;  %p1335_p9 = scmp.lt.s32.totalorder %s998_s20, %s998_s20 }
 0x241   :  { %p1331_p8 = scmp.ne.s32.totalorder %s998_s20, %s1330_s21  ;;  %p1336_p10 = scmp.lt.s32.totalorder %s1330_s21, %s1330_s21 }
 0x242   :  { %828 = vmatpush1.bf16.msra.mxu1 %v1247_v3  ;;  %v477_v3 = vrot.slane %v472_v0, %v476_v63 }
 0x243   :  { %829 = vmatprep.subr.bf16.mxu1 %v1252_v4  ;;  %p1337_p11 = por %p1336_p10, %p1335_p9 }
 0x245   :  { %p1338_p12 = pnand %p1337_p11, %p1331_p8 }
 0x246   :  { %830 = vmatpush1.bf16.msra.mxu1 %v1250_v5  ;;  %v481_v5 = vrot.slane %v472_v0, %v480_v2 }
 0x247   :  { %831 = vmatprep.subr.bf16.mxu1 %v1255_v6 }
 0x24a   :  { %832 = vmatpush1.bf16.msra.mxu1 %v1253_v7 }
 0x24b   :  { %833 = vmatprep.subr.bf16.mxu1 %v1258_v8 }
 0x24e   :  { %834 = vmatpush1.bf16.msra.mxu1 %v1256_v9 }
 0x24f   :  { %835 = vmatprep.subr.bf16.mxu1 %v1261_v10 }
 0x252   :  { %836 = vmatpush1.bf16.msra.mxu1 %v1259_v11 }
 0x253   :  { %837 = vmatprep.subr.bf16.mxu1 %v1267_v12 }
 0x256   :  { %838 = vmatpush1.bf16.msra.mxu1 %v1265_v13 }
 0x257   :  { %839 = vmatprep.subr.bf16.mxu1 %v1273_v14 }
 0x25a   :  { %840 = vmatpush1.bf16.msra.mxu1 %v1271_v15 }
 0x25b   :  { %841 = vmatprep.subr.bf16.mxu1 %v1279_v16 }
 0x25e   :  { %842 = vmatpush1.bf16.msra.mxu1 %v1277_v17 }
 0x25f   :  { %843 = vmatprep.subr.bf16.mxu1 %v1285_v20 }
 0x262   :  { %844 = vmatpush1.bf16.msra.mxu1 %v1283_v21 }
 0x2f8   :  { %v342_v28 = vpop.f32.mrb[0].mxu1  ;;  %v383_v29 = vpop.f32.mrb[4].mxu0 }
 0x2f9   :  { %v343_v30 = vadd.f32 %v342_v28, %v177_v25  ;;  %v384_v31 = vadd.f32 %v383_v29, %v179_v26  ;;  %v344_v32 = vpop.f32.mrb[1].mxu1  ;;  %v1163_v33 = vpop.f32.mrb[5].mxu0 }
 0x2fa   :  { %v345_v34 = vadd.f32 %v344_v32, %v178_v27  ;;  %v346_v35 = vpop.f32.mrb[2].mxu1  ;;  %v386_v36 = vpop.f32.mrb[6].mxu0 }
 0x2fb   :  { %v391_v38 = vpack.c.bf16 %v384_v31, %v384_v31  ;;  %v347_v39 = vpop.f32.mrb[3].mxu1  ;;  %v1164_v40 = vpop.f32.mrb[7].mxu0  ;;  %v389_v43 = vpack.c.bf16 %v343_v30, %v343_v30 }
 0x2fc   :  { %v390_v41 = vpack.c.bf16 %v345_v34, %v345_v34 }
 0x2fd   :  { %1093 = vmatmul.mubr.msk.bf16.vlgmr.msra.gmra.mrb[8].mxu0 %vm809_vm5, %v391_v38 }
 0x2fe   :  { %1112 = vmatpush3.bf16.msra.mxu0 %v1287_v37  ;;  %845 = vmatprep.mubr.bf16.mxu1 %v390_v41 }
 0x2ff   :  { %927 = vmatprep.mubr.bf16.mxu0 %v390_v41  ;;  %846 = vmatmul.mubr.bf16.vlgmr.msra.gmra.mrb[4].mxu1 %v389_v43 }
 0x300   :  { %1113 = vmatprep.subr.bf16.mxu0 %v1288_v42 }
 0x302   :  { %1114 = vmatpush3.bf16.msra.mxu0 %v1289_v44 }
 0x303   :  { %1115 = vmatprep.subr.bf16.mxu0 %v1290_v45 }
 0x306   :  { %1116 = vmatpush3.bf16.msra.mxu0 %v1291_v46 }
 0x307   :  { %1117 = vmatprep.subr.bf16.mxu0 %v1292_v47 }
 0x30a   :  { %1118 = vmatpush3.bf16.msra.mxu0 %v1293_v48 }
 0x30b   :  { %1119 = vmatprep.subr.bf16.mxu0 %v1294_v49 }
 0x30e   :  { %1120 = vmatpush3.bf16.msra.mxu0 %v1295_v50 }
 0x30f   :  { %1121 = vmatprep.subr.bf16.mxu0 %v1296_v51 }
 0x312   :  { %1122 = vmatpush3.bf16.msra.mxu0 %v1297_v52 }
 0x313   :  { %1123 = vmatprep.subr.bf16.mxu0 %v1298_v53 }
 0x316   :  { %1124 = vmatpush3.bf16.msra.mxu0 %v1299_v54 }
 0x317   :  { %1125 = vmatprep.subr.bf16.mxu0 %v1300_v55 }
 0x31a   :  { %1126 = vmatpush3.bf16.msra.mxu0 %v1301_v56 }
 0x31b   :  { %1165 = vmatprep.subr.bf16.mxu0 %v1361_v1 }
 0x31d   :  { %928 = vmatmul.mubr.bf16.vlgmr.msra.gmra.mrb[12].mxu0 %v389_v43 }
 0x31e   :  { %1166 = vmatpush3.bf16.msra.mxu0 %v1302_v57  ;;  %1173 = vmatprep.mubr.msk.bf16.mxu0 %vm1360_vm0, %v1361_v1 }
 0x31f   :  { %1167 = vmatprep.subr.bf16.mxu0 %v1361_v1 }
 0x322   :  { %1168 = vmatpush3.bf16.msra.mxu0 %v1303_v58 }
 0x323   :  { %1169 = vmatprep.subr.bf16.mxu0 %v1361_v1 }
 0x326   :  { %1170 = vmatpush3.bf16.msra.mxu0 %v1304_v59 }
 0x327   :  { %1171 = vmatprep.subr.bf16.mxu0 %v1361_v1 }
 0x32a   :  { %1172 = vmatpush3.bf16.msra.mxu0 %v1305_v60 }
 0x32d   :  { %1174 = vmatmul.mubr.msk.bf16.vlgmr.msra.gmra.mrb[16].mxu0 %vm809_vm5, %v391_v38 }
 0x3d0   :  { %v888_v4 = vpop.f32.mrb[8].mxu0 }
 0x3d1   :  { %v890_v6 = vpop.f32.mrb[9].mxu0 }
 0x3d2   :  { %v847_v7 = vpop.f32.mrb[4].mxu1  ;;  %v892_v8 = vpop.f32.mrb[10].mxu0 }
 0x3d3   :  { %v848_v9 = vadd.f32 %v847_v7, %v477_v3  ;;  %v849_v10 = vpop.f32.mrb[5].mxu1  ;;  %v893_v1 = vpop.f32.mrb[11].mxu0 }
 0x3d4   :  { %v850_v11 = vadd.f32 %v849_v10, %v481_v5  ;;  %v851_v12 = vpop.f32.mrb[6].mxu1 }
 0x3d5   :  { %v889_v13 = vadd.f32 %v888_v4, %v848_v9  ;;  %v852_v14 = vpop.f32.mrb[7].mxu1 }
 0x3d6   :  { %v891_v15 = vadd.f32 %v890_v6, %v850_v11 }
 0x3d8   :  { %v1097_v16 = vpack.c.bf16 %v891_v15, %v889_v13 }
 0x3da   :  { %988 = vst [vmem:[#allocation5] sm:$0xff] %v1097_v16 }
 0x3f0   :  { %v1127_v17 = vpop.f32.mrb[12].mxu0 }
 0x3f1   :  { %v1128_v18 = vpop.f32.mrb[13].mxu0 }
 0x3f2   :  { %v1129_v19 = vadd.f32 %v1128_v18, %v1127_v17  ;;  %v1130_v20 = vpop.f32.mrb[14].mxu0 }
 0x3f3   :  { %v1131_v21 = vpop.f32.mrb[15].mxu0 }
 0x3f4   :  { %v930_v24 = vadd.f32 %v1129_v19, %v485_v23 }
 0x400   :  { %v969_v25 = vpop.f32.mrb[16].mxu0 }
 0x401   :  { %v970_v26 = vadd.f32 %v969_v25, %v930_v24  ;;  %v1175_v27 = vpop.f32.mrb[17].mxu0 }
 0x402   :  { %v972_v28 = vpop.f32.mrb[18].mxu0 }
 0x403   :  { %v1098_v29 = vpack.c.bf16 %v970_v26, %v970_v26  ;;  %v1176_v30 = vpop.f32.mrb[19].mxu0 }
 0x405   :  { %990 = vst.msk [vmem:[#allocation5 + $0x8] sm:$0xf] %vm989_vm6, %v1098_v29 }
 0x406   :  { %1341 = shalt.err (!%p1338_p12)
}
 0x407   :  { %s1342_s0 = scalar_lea.hbm %s1549_s7, 192 }
 0x408   :  { %p1343_p13 = scmp.ne.s32.totalorder %s1549_s7, %s1342_s0  ;;  %p1346_p0 = scmp.lt.u32.totalorder %s1342_s0, %s1549_s7 }
 0x40a   :  { %p1348_p1 = pnand %p1346_p0, %p1343_p13 }
 0x40c   :  { %1351 = shalt.err (!%p1348_p1)
}
 0x40d   :  { %1000 = dma.vmem_to_hbm [thread:$0]  %s998_s20, 192, %s1549_s7, [#allocation4]  }
 0x40e   :  { %1354 = dma.done.wait [#allocation4], 192  }
 0x40f   :  { %1355 = vsyncadd [#allocation4], 4294967104 }
 0x410   :  { %1004 = vsyncpa [#allocation3], 1 }
 0x411   :  { %1005 = vsyncpa [#allocation4], 1 }

</bundles_post_ra>
